<compile_context>
chip_gen: v7x
topology: tpu7x:2x2x1
jax: 0.10.0
libtpu: 0.0.40
codegen_flags: <defaults>
</compile_context>

<pallas_src>
import functools
import math

import jax
import jax.numpy as jnp
import numpy as np
from jax import lax
from jax.experimental import pallas as pl
from jax.experimental.pallas import tpu as pltpu


def _attention_stem_kernel(x_ref, w_ref, o_ref, *, cout, ksize, stride, pad,
                           wp, t_h, w_out):
    """One (batch, H-tile) grid step.

    x_ref : (1, 1, Cin, ncols)  channel-major flattened padded-input rows for
                                this tile (halo rows included).
    w_ref : (Nf, Cin)           fused 1x1-conv weight, Nf = (2 + K*K) * Cout.
                                Row groups: [query | key | v_(0,0)..v_(K-1,K-1)]
                                where v_(a,b) = sum_m softmax_m(emb)[m,a,b]*wv_m.
    o_ref : (1, Cout, t_h*W)    output tile (lane-dense minor dim).
    """
    K = ksize
    xs = x_ref[0, 0]                                         # (Cin, ncols)

    # Single fused MXU matmul for all query/key/mixed-value feature maps.
    # (q is also computed over the thin padding ring: <2% extra MXU work,
    #  cheaper than breaking the fusion.)
    feat = jnp.dot(w_ref[...], xs,
                   preferred_element_type=jnp.float32)       # (Nf, ncols) f32

    # Output pixel (i, j) of this tile lives at lane l = i*wp + j of every
    # slab below; the (wp - w_out) extra lanes per row are harmless filler
    # that is dropped just before the store.
    span = (t_h - 1) * wp + w_out

    def window(group, a, b):
        d0 = a * wp + b
        if stride == 1:
            return lax.slice(feat, (group * cout, d0),
                             ((group + 1) * cout, d0 + span))
        # TODO(synk): stride > 1 uses a lane-strided slice; correct but not
        # exercised by the test below (H-tiling is disabled for it).
        return lax.slice(feat, (group * cout, d0),
                         ((group + 1) * cout, d0 + stride * (span - 1) + 1),
                         (1, stride))

    # Query map: taken at the un-padded pixel positions, never strided.
    q = lax.slice(feat, (0, pad * wp + pad), (cout, pad * wp + pad + span))

    # ---- two-pass softmax over the K*K window positions -------------------
    m = None
    for a in range(K):
        for b in range(K):
            lg = q * window(1, a, b)
            m = lg if m is None else jnp.maximum(m, lg)

    denom = jnp.zeros_like(m)
    acc = jnp.zeros_like(m)
    for a in range(K):
        for b in range(K):
            p = jnp.exp(q * window(1, a, b) - m)
            denom = denom + p
            acc = acc + p * window(2 + a * K + b, a, b)

    inv = pl.reciprocal(denom, approx=True)        # EUP vrcp (free slot)
    inv = inv * (2.0 - denom * inv)                # one Newton step -> ~f32 exact
    res = acc * inv                                # (Cout, span)

    # Drop the filler lanes per output row and store one dense block.
    rows = [lax.slice(res, (0, i * wp), (cout, i * wp + w_out))
            for i in range(t_h)]
    o_ref[0] = jnp.concatenate(rows, axis=1).astype(o_ref.dtype)


def _pick_tile_h(H, W, stride):
    """Output rows per grid step.  The output block's minor dim (t_h * W) must
    be a multiple of 128 lanes unless it spans the whole output."""
    if stride == 1:
        for t_h in (8, 16, 32):
            if H % t_h == 0 and (t_h * W) % 128 == 0 and H // t_h > 1:
                return t_h, H // t_h
    return H, 1


def attention_stem_pallas(x_nchw, wq, wk, wv, emb_a, emb_b, emb_mix, *,
                          kernel_size, stride=1, padding=0, groups=1,
                          matmul_dtype=jnp.bfloat16):
    """Forward pass matching AttentionStem.forward (PyTorch, NCHW in / out).

    `groups` only reshapes the channel axis in the reference module (the math
    is identical per channel), so apart from the shape assert it does not
    change the kernel.
    """
    B, Cin, H, W = x_nchw.shape
    Cout = wq.shape[1]
    M = wv.shape[0]
    K = kernel_size
    assert Cout % groups == 0
    Hp, Wp = H + 2 * padding, W + 2 * padding
    assert Hp >= stride * (H - 1) + K and Wp >= stride * (W - 1) + K, (
        "padding/stride/kernel_size combination does not cover the output")

    # ---- parameter-only preprocessing (tiny: M x K x K) --------------------
    logit_a = emb_mix @ emb_a                                    # (M, K)
    logit_b = emb_mix @ emb_b                                    # (M, K)
    emb = logit_a[:, :, None] + logit_b[:, None, :]              # (M, K, K)
    emb_soft = jax.nn.softmax(emb.reshape(M, K * K), axis=0)     # (M, K*K)

    # Fold the positional value mixing into the conv weights.
    wv_mixed = jnp.einsum('mk,mio->kio', emb_soft, wv)           # (K*K, Cin, Cout)
    w_all = jnp.concatenate([wq[None], wk[None], wv_mixed], 0)   # (2+K*K, Cin, Cout)
    Nf = (2 + K * K) * Cout
    # Row g*Cout + c of the fused weight produces channel c of group g, so the
    # kernel slices feature groups as cheap sublane ranges.
    w_fused_t = w_all.transpose(0, 2, 1).reshape(Nf, Cin).astype(matmul_dtype)

    # ---- input: pad, flatten channel-major, materialise halo'd H tiles -----
    xp = jnp.pad(x_nchw, ((0, 0), (0, 0), (padding, padding),
                          (padding, padding))).astype(matmul_dtype)
    xp_flat = xp.reshape(B, Cin, Hp * Wp)

    t_h, n_h = _pick_tile_h(H, W, stride)
    if n_h == 1:
        nrows = Hp
        x_tiles = xp_flat[:, None]                        # (B, 1, Cin, Hp*Wp)
    else:
        # Duplicating the small halo here keeps every index inside the kernel
        # static (no dynamic minor-dim slicing); the extra HBM copy is
        # ~(1 + halo/t_h) x the (bf16) input, far smaller than the output.
        nrows = t_h + max(padding, K - 1)
        x_tiles = jnp.stack(
            [lax.slice(xp_flat, (0, 0, t * t_h * Wp),
                       (B, Cin, t * t_h * Wp + nrows * Wp))
             for t in range(n_h)], axis=1)                # (B, n_h, Cin, nrows*Wp)
    ncols = nrows * Wp

    kernel = functools.partial(
        _attention_stem_kernel, cout=Cout, ksize=K, stride=stride,
        pad=padding, wp=Wp, t_h=t_h, w_out=W)

    # ---- compiler hints ----------------------------------------------------
    def _rup(n, m):
        return ((n + m - 1) // m) * m

    itm = jnp.dtype(matmul_dtype).itemsize
    feat_b = _rup(Nf, 8) * _rup(ncols, 128) * 4
    slab_b = _rup(Cout, 8) * _rup((t_h - 1) * Wp + W, 128) * 4
    in_b = _rup(Cin, 8) * _rup(ncols, 128) * itm
    out_b = _rup(Cout, 8) * _rup(t_h * W, 128) * 4
    w_b = _rup(Nf, 8) * _rup(Cin, 128) * itm
    est = 2 * feat_b + 16 * slab_b + 3 * (in_b + out_b) + 2 * w_b
    vmem_limit = int(min(110 * 2 ** 20, max(32 * 2 ** 20, 4 * est)))

    cost = pl.CostEstimate(
        flops=2 * B * n_h * ncols * Cin * Nf + 8 * B * H * W * Cout * K * K,
        transcendentals=B * H * W * Cout * K * K,
        bytes_accessed=B * n_h * Cin * ncols * itm + Nf * Cin * itm
        + B * Cout * H * W * 4)

    out_flat = pl.pallas_call(
        kernel,
        out_shape=jax.ShapeDtypeStruct((B, Cout, H * W), jnp.float32),
        grid=(B, n_h),
        in_specs=[
            pl.BlockSpec((1, 1, Cin, ncols), lambda b, t: (b, t, 0, 0)),
            pl.BlockSpec((Nf, Cin), lambda b, t: (0, 0)),
        ],
        out_specs=pl.BlockSpec((1, Cout, t_h * W), lambda b, t: (b, 0, t)),
        compiler_params=pltpu.CompilerParams(
            dimension_semantics=("parallel", "parallel"),
            vmem_limit_bytes=vmem_limit),
        cost_estimate=cost,
    )(x_tiles, w_fused_t)

    return out_flat.reshape(B, Cout, H, W)                 # already NCHW


def init_params(key, in_channels, out_channels, kernel_size, m, groups):
    """Deterministic synthetic parameters (kaiming-fan_out-style scaling)."""
    ks = jax.random.split(key, 6)
    std = math.sqrt(2.0 / out_channels)            # fan_out for a 1x1 conv
    wq = jax.random.normal(ks[0], (in_channels, out_channels), jnp.float32) * std
    wk = jax.random.normal(ks[1], (in_channels, out_channels), jnp.float32) * std
    wv = jax.random.normal(ks[2], (m, in_channels, out_channels), jnp.float32) * std
    emb_a = jax.random.normal(ks[3], (out_channels // groups, kernel_size), jnp.float32)
    emb_b = jax.random.normal(ks[4], (out_channels // groups, kernel_size), jnp.float32)
    emb_mix = jax.random.normal(ks[5], (m, out_channels // groups), jnp.float32)
    return wq, wk, wv, emb_a, emb_b, emb_mix


def ref_forward(x, wq, wk, wv, emb_a, emb_b, emb_mix, *,
                kernel_size, stride=1, padding=0):
    """Pure-JAX reference mirroring the PyTorch forward (NCHW)."""
    B, Cin, H, W = x.shape
    M = wv.shape[0]
    K = kernel_size

    logit_a = emb_mix @ emb_a
    logit_b = emb_mix @ emb_b
    emb = logit_a[:, :, None] + logit_b[:, None, :]
    emb_soft = jax.nn.softmax(emb.reshape(M, -1), axis=0).reshape(M, K, K)

    xp = jnp.pad(x, ((0, 0), (0, 0), (padding, padding), (padding, padding)))
    q = jnp.einsum('bihw,io->bohw', x, wq)
    kf = jnp.einsum('bihw,io->bohw', xp, wk)
    vf = jnp.einsum('bihw,mio->mbohw', xp, wv)

    logits, vmix = [], []
    for a in range(K):
        for b in range(K):
            hs = slice(a, a + stride * (H - 1) + 1, stride)
            ws = slice(b, b + stride * (W - 1) + 1, stride)
            logits.append(q * kf[:, :, hs, ws])
            vm = 0.0
            for m in range(M):
                vm = vm + emb_soft[m, a, b] * vf[m, :, :, hs, ws]
            vmix.append(vm)
    logits = jnp.stack(logits, axis=-1)            # (B, Cout, H, W, K*K)
    vmix = jnp.stack(vmix, axis=-1)
    attn = jax.nn.softmax(logits, axis=-1)
    return jnp.sum(attn * vmix, axis=-1)           # (B, Cout, H, W)


if __name__ == "__main__":
    B, Cin, H, W = 2, 4, 16, 16
    Cout, K, stride, padding, groups, M = 8, 3, 1, 1, 2, 4

    key = jax.random.PRNGKey(0)
    kx, kp = jax.random.split(key)
    x = jax.random.normal(kx, (B, Cin, H, W), jnp.float32)
    wq, wk, wv, emb_a, emb_b, emb_mix = init_params(kp, Cin, Cout, K, M, groups)

    ref = ref_forward(x, wq, wk, wv, emb_a, emb_b, emb_mix,
                      kernel_size=K, stride=stride, padding=padding)

    # 1) full-f32 matmul path: tight check of the kernel semantics.
    out = attention_stem_pallas(x, wq, wk, wv, emb_a, emb_b, emb_mix,
                                kernel_size=K, stride=stride, padding=padding,
                                groups=groups, matmul_dtype=jnp.float32)
    out = jax.block_until_ready(out)
    np.testing.assert_allclose(np.asarray(out), np.asarray(ref),
                               rtol=1e-3, atol=1e-3)

    # 2) default production path: bf16 MXU inputs, f32 accumulation.  Compared
    #    against the same reference evaluated with bf16-rounded conv inputs.
    out_bf16 = attention_stem_pallas(x, wq, wk, wv, emb_a, emb_b, emb_mix,
                                     kernel_size=K, stride=stride,
                                     padding=padding, groups=groups,
                                     matmul_dtype=jnp.bfloat16)
    out_bf16 = jax.block_until_ready(out_bf16)
    rb = lambda a: a.astype(jnp.bfloat16).astype(jnp.float32)
    ref_bf16 = ref_forward(rb(x), rb(wq), rb(wk), rb(wv), emb_a, emb_b,
                           emb_mix, kernel_size=K, stride=stride,
                           padding=padding)
    np.testing.assert_allclose(np.asarray(out_bf16), np.asarray(ref_bf16),
                               rtol=2e-2, atol=2e-2)

    print("KERNEL_OK")
</pallas_src>

<mosaic_0001>
module attributes {stable_mosaic.version = 11 : i64} {
  func.func @_attention_stem_kernel(%arg0: i32, %arg1: i32, %arg2: memref<1x1x4x180xf32, #tpu.memory_space<vmem>>, %arg3: memref<88x4xf32, #tpu.memory_space<vmem>>, %arg4: memref<1x8x128xf32, #tpu.memory_space<vmem>>) attributes {dimension_semantics = [#tpu.dimension_semantics<parallel>, #tpu.dimension_semantics<parallel>], iteration_bounds = array<i64: 2, 2>, scalar_prefetch = 0 : i64, scratch_operands = 0 : i64, tpu.core_type = #tpu.core_type<tc>, window_params = [{transform_indices = @transform_0, window_bounds = array<i64: 1, 1, 4, 180>}, {pipeline_mode = #tpu.pipeline_mode<synchronous>, transform_indices = @transform_1, window_bounds = array<i64: 88, 4>}, {transform_indices = @transform_2, window_bounds = array<i64: 1, 8, 128>}]} {
    %c0 = arith.constant 0 : index
    %c0_0 = arith.constant 0 : index
    %c0_1 = arith.constant 0 : index
    %c0_2 = arith.constant 0 : index
    %0 = vector.load %arg2[%c0, %c0_0, %c0_1, %c0_2] : memref<1x1x4x180xf32, #tpu.memory_space<vmem>>, vector<1x1x4x180xf32>
    %1 = vector.shape_cast %0 : vector<1x1x4x180xf32> to vector<4x180xf32>
    %c0_3 = arith.constant 0 : index
    %c0_4 = arith.constant 0 : index
    %2 = vector.load %arg3[%c0_3, %c0_4] : memref<88x4xf32, #tpu.memory_space<vmem>>, vector<88x4xf32>
    %cst = arith.constant dense<0.000000e+00> : vector<88x180xf32>
    %3 = tpu.matmul %2, %1, %cst {dimension_numbers = #tpu.dot_dimension_numbers<[1], [0], [0], [1], [0, 0, 1, 1], [], []>} : vector<88x4xf32>, vector<4x180xf32>, vector<88x180xf32> -> vector<88x180xf32>
    %4 = vector.extract_strided_slice %3 {offsets = [0, 19], sizes = [8, 142], strides = [1, 1]} : vector<88x180xf32> to vector<8x142xf32>
    %5 = vector.extract_strided_slice %3 {offsets = [8, 0], sizes = [8, 142], strides = [1, 1]} : vector<88x180xf32> to vector<8x142xf32>
    %6 = arith.mulf %4, %5 : vector<8x142xf32>
    %7 = vector.extract_strided_slice %3 {offsets = [8, 1], sizes = [8, 142], strides = [1, 1]} : vector<88x180xf32> to vector<8x142xf32>
    %8 = arith.mulf %4, %7 : vector<8x142xf32>
    %9 = arith.maximumf %6, %8 : vector<8x142xf32>
    %10 = vector.extract_strided_slice %3 {offsets = [8, 2], sizes = [8, 142], strides = [1, 1]} : vector<88x180xf32> to vector<8x142xf32>
    %11 = arith.mulf %4, %10 : vector<8x142xf32>
    %12 = arith.maximumf %9, %11 : vector<8x142xf32>
    %13 = vector.extract_strided_slice %3 {offsets = [8, 18], sizes = [8, 142], strides = [1, 1]} : vector<88x180xf32> to vector<8x142xf32>
    %14 = arith.mulf %4, %13 : vector<8x142xf32>
    %15 = arith.maximumf %12, %14 : vector<8x142xf32>
    %16 = vector.extract_strided_slice %3 {offsets = [8, 19], sizes = [8, 142], strides = [1, 1]} : vector<88x180xf32> to vector<8x142xf32>
    %17 = arith.mulf %4, %16 : vector<8x142xf32>
    %18 = arith.maximumf %15, %17 : vector<8x142xf32>
    %19 = vector.extract_strided_slice %3 {offsets = [8, 20], sizes = [8, 142], strides = [1, 1]} : vector<88x180xf32> to vector<8x142xf32>
    %20 = arith.mulf %4, %19 : vector<8x142xf32>
    %21 = arith.maximumf %18, %20 : vector<8x142xf32>
    %22 = vector.extract_strided_slice %3 {offsets = [8, 36], sizes = [8, 142], strides = [1, 1]} : vector<88x180xf32> to vector<8x142xf32>
    %23 = arith.mulf %4, %22 : vector<8x142xf32>
    %24 = arith.maximumf %21, %23 : vector<8x142xf32>
    %25 = vector.extract_strided_slice %3 {offsets = [8, 37], sizes = [8, 142], strides = [1, 1]} : vector<88x180xf32> to vector<8x142xf32>
    %26 = arith.mulf %4, %25 : vector<8x142xf32>
    %27 = arith.maximumf %24, %26 : vector<8x142xf32>
    %28 = vector.extract_strided_slice %3 {offsets = [8, 38], sizes = [8, 142], strides = [1, 1]} : vector<88x180xf32> to vector<8x142xf32>
    %29 = arith.mulf %4, %28 : vector<8x142xf32>
    %30 = arith.maximumf %27, %29 : vector<8x142xf32>
    %cst_5 = arith.constant 0.000000e+00 : f32
    %31 = vector.broadcast %cst_5 : f32 to vector<8x142xf32>
    %cst_6 = arith.constant 0.000000e+00 : f32
    %32 = vector.broadcast %cst_6 : f32 to vector<8x142xf32>
    %33 = vector.extract_strided_slice %3 {offsets = [8, 0], sizes = [8, 142], strides = [1, 1]} : vector<88x180xf32> to vector<8x142xf32>
    %34 = arith.mulf %4, %33 : vector<8x142xf32>
    %35 = arith.subf %34, %30 : vector<8x142xf32>
    %36 = math.exp %35 : vector<8x142xf32>
    %37 = arith.addf %31, %36 : vector<8x142xf32>
    %38 = vector.extract_strided_slice %3 {offsets = [16, 0], sizes = [8, 142], strides = [1, 1]} : vector<88x180xf32> to vector<8x142xf32>
    %39 = arith.mulf %36, %38 : vector<8x142xf32>
    %40 = arith.addf %32, %39 : vector<8x142xf32>
    %41 = vector.extract_strided_slice %3 {offsets = [8, 1], sizes = [8, 142], strides = [1, 1]} : vector<88x180xf32> to vector<8x142xf32>
    %42 = arith.mulf %4, %41 : vector<8x142xf32>
    %43 = arith.subf %42, %30 : vector<8x142xf32>
    %44 = math.exp %43 : vector<8x142xf32>
    %45 = arith.addf %37, %44 : vector<8x142xf32>
    %46 = vector.extract_strided_slice %3 {offsets = [24, 1], sizes = [8, 142], strides = [1, 1]} : vector<88x180xf32> to vector<8x142xf32>
    %47 = arith.mulf %44, %46 : vector<8x142xf32>
    %48 = arith.addf %40, %47 : vector<8x142xf32>
    %49 = vector.extract_strided_slice %3 {offsets = [8, 2], sizes = [8, 142], strides = [1, 1]} : vector<88x180xf32> to vector<8x142xf32>
    %50 = arith.mulf %4, %49 : vector<8x142xf32>
    %51 = arith.subf %50, %30 : vector<8x142xf32>
    %52 = math.exp %51 : vector<8x142xf32>
    %53 = arith.addf %45, %52 : vector<8x142xf32>
    %54 = vector.extract_strided_slice %3 {offsets = [32, 2], sizes = [8, 142], strides = [1, 1]} : vector<88x180xf32> to vector<8x142xf32>
    %55 = arith.mulf %52, %54 : vector<8x142xf32>
    %56 = arith.addf %48, %55 : vector<8x142xf32>
    %57 = vector.extract_strided_slice %3 {offsets = [8, 18], sizes = [8, 142], strides = [1, 1]} : vector<88x180xf32> to vector<8x142xf32>
    %58 = arith.mulf %4, %57 : vector<8x142xf32>
    %59 = arith.subf %58, %30 : vector<8x142xf32>
    %60 = math.exp %59 : vector<8x142xf32>
    %61 = arith.addf %53, %60 : vector<8x142xf32>
    %62 = vector.extract_strided_slice %3 {offsets = [40, 18], sizes = [8, 142], strides = [1, 1]} : vector<88x180xf32> to vector<8x142xf32>
    %63 = arith.mulf %60, %62 : vector<8x142xf32>
    %64 = arith.addf %56, %63 : vector<8x142xf32>
    %65 = vector.extract_strided_slice %3 {offsets = [8, 19], sizes = [8, 142], strides = [1, 1]} : vector<88x180xf32> to vector<8x142xf32>
    %66 = arith.mulf %4, %65 : vector<8x142xf32>
    %67 = arith.subf %66, %30 : vector<8x142xf32>
    %68 = math.exp %67 : vector<8x142xf32>
    %69 = arith.addf %61, %68 : vector<8x142xf32>
    %70 = vector.extract_strided_slice %3 {offsets = [48, 19], sizes = [8, 142], strides = [1, 1]} : vector<88x180xf32> to vector<8x142xf32>
    %71 = arith.mulf %68, %70 : vector<8x142xf32>
    %72 = arith.addf %64, %71 : vector<8x142xf32>
    %73 = vector.extract_strided_slice %3 {offsets = [8, 20], sizes = [8, 142], strides = [1, 1]} : vector<88x180xf32> to vector<8x142xf32>
    %74 = arith.mulf %4, %73 : vector<8x142xf32>
    %75 = arith.subf %74, %30 : vector<8x142xf32>
    %76 = math.exp %75 : vector<8x142xf32>
    %77 = arith.addf %69, %76 : vector<8x142xf32>
    %78 = vector.extract_strided_slice %3 {offsets = [56, 20], sizes = [8, 142], strides = [1, 1]} : vector<88x180xf32> to vector<8x142xf32>
    %79 = arith.mulf %76, %78 : vector<8x142xf32>
    %80 = arith.addf %72, %79 : vector<8x142xf32>
    %81 = vector.extract_strided_slice %3 {offsets = [8, 36], sizes = [8, 142], strides = [1, 1]} : vector<88x180xf32> to vector<8x142xf32>
    %82 = arith.mulf %4, %81 : vector<8x142xf32>
    %83 = arith.subf %82, %30 : vector<8x142xf32>
    %84 = math.exp %83 : vector<8x142xf32>
    %85 = arith.addf %77, %84 : vector<8x142xf32>
    %86 = vector.extract_strided_slice %3 {offsets = [64, 36], sizes = [8, 142], strides = [1, 1]} : vector<88x180xf32> to vector<8x142xf32>
    %87 = arith.mulf %84, %86 : vector<8x142xf32>
    %88 = arith.addf %80, %87 : vector<8x142xf32>
    %89 = vector.extract_strided_slice %3 {offsets = [8, 37], sizes = [8, 142], strides = [1, 1]} : vector<88x180xf32> to vector<8x142xf32>
    %90 = arith.mulf %4, %89 : vector<8x142xf32>
    %91 = arith.subf %90, %30 : vector<8x142xf32>
    %92 = math.exp %91 : vector<8x142xf32>
    %93 = arith.addf %85, %92 : vector<8x142xf32>
    %94 = vector.extract_strided_slice %3 {offsets = [72, 37], sizes = [8, 142], strides = [1, 1]} : vector<88x180xf32> to vector<8x142xf32>
    %95 = arith.mulf %92, %94 : vector<8x142xf32>
    %96 = arith.addf %88, %95 : vector<8x142xf32>
    %97 = vector.extract_strided_slice %3 {offsets = [8, 38], sizes = [8, 142], strides = [1, 1]} : vector<88x180xf32> to vector<8x142xf32>
    %98 = arith.mulf %4, %97 : vector<8x142xf32>
    %99 = arith.subf %98, %30 : vector<8x142xf32>
    %100 = math.exp %99 : vector<8x142xf32>
    %101 = arith.addf %93, %100 : vector<8x142xf32>
    %102 = vector.extract_strided_slice %3 {offsets = [80, 38], sizes = [8, 142], strides = [1, 1]} : vector<88x180xf32> to vector<8x142xf32>
    %103 = arith.mulf %100, %102 : vector<8x142xf32>
    %104 = arith.addf %96, %103 : vector<8x142xf32>
    %105 = tpu.reciprocal %101 {approx = true} : vector<8x142xf32> -> vector<8x142xf32>
    %106 = arith.mulf %101, %105 : vector<8x142xf32>
    %cst_7 = arith.constant 2.000000e+00 : f32
    %107 = vector.broadcast %cst_7 : f32 to vector<8x142xf32>
    %108 = arith.subf %107, %106 : vector<8x142xf32>
    %109 = arith.mulf %105, %108 : vector<8x142xf32>
    %110 = arith.mulf %104, %109 : vector<8x142xf32>
    %111 = vector.extract_strided_slice %110 {offsets = [0, 0], sizes = [8, 16], strides = [1, 1]} : vector<8x142xf32> to vector<8x16xf32>
    %112 = vector.extract_strided_slice %110 {offsets = [0, 18], sizes = [8, 16], strides = [1, 1]} : vector<8x142xf32> to vector<8x16xf32>
    %113 = vector.extract_strided_slice %110 {offsets = [0, 36], sizes = [8, 16], strides = [1, 1]} : vector<8x142xf32> to vector<8x16xf32>
    %114 = vector.extract_strided_slice %110 {offsets = [0, 54], sizes = [8, 16], strides = [1, 1]} : vector<8x142xf32> to vector<8x16xf32>
    %115 = vector.extract_strided_slice %110 {offsets = [0, 72], sizes = [8, 16], strides = [1, 1]} : vector<8x142xf32> to vector<8x16xf32>
    %116 = vector.extract_strided_slice %110 {offsets = [0, 90], sizes = [8, 16], strides = [1, 1]} : vector<8x142xf32> to vector<8x16xf32>
    %117 = vector.extract_strided_slice %110 {offsets = [0, 108], sizes = [8, 16], strides = [1, 1]} : vector<8x142xf32> to vector<8x16xf32>
    %118 = vector.extract_strided_slice %110 {offsets = [0, 126], sizes = [8, 16], strides = [1, 1]} : vector<8x142xf32> to vector<8x16xf32>
    %119 = tpu.concatenate %111, %112, %113, %114, %115, %116, %117, %118 in 1 : vector<8x16xf32>, vector<8x16xf32>, vector<8x16xf32>, vector<8x16xf32>, vector<8x16xf32>, vector<8x16xf32>, vector<8x16xf32>, vector<8x16xf32> -> vector<8x128xf32>
    %c0_8 = arith.constant 0 : index
    %c0_9 = arith.constant 0 : index
    %c0_10 = arith.constant 0 : index
    %120 = vector.load %arg4[%c0_8, %c0_9, %c0_10] : memref<1x8x128xf32, #tpu.memory_space<vmem>>, vector<1x8x128xf32>
    %121 = vector.shape_cast %120 : vector<1x8x128xf32> to vector<8x128xf32>
    %122 = vector.shape_cast %119 : vector<8x128xf32> to vector<1x8x128xf32>
    tpu.vector_store %arg4[%c0_8, %c0_9, %c0_10], %122 {strides = array<i32>} : memref<1x8x128xf32, #tpu.memory_space<vmem>>, vector<1x8x128xf32>,
    return
  }
  func.func @transform_0(%arg0: i32, %arg1: i32) -> (i32, i32, i32, i32) {
    %c0_i32 = arith.constant 0 : i32
    %c0_i32_0 = arith.constant 0 : i32
    %c0_i32_1 = arith.constant 0 : i32
    return %arg0, %arg1, %c0_i32, %c0_i32_0 : i32, i32, i32, i32
  }
  func.func @transform_1(%arg0: i32, %arg1: i32) -> (i32, i32) {
    %c0_i32 = arith.constant 0 : i32
    %c0_i32_0 = arith.constant 0 : i32
    %c0_i32_1 = arith.constant 0 : i32
    return %c0_i32, %c0_i32_0 : i32, i32
  }
  func.func @transform_2(%arg0: i32, %arg1: i32) -> (i32, i32, i32) {
    %c0_i32 = arith.constant 0 : i32
    %c0_i32_0 = arith.constant 0 : i32
    return %arg0, %c0_i32, %arg1 : i32, i32, i32
  }
}

</mosaic_0001>

<bundles_post_ra>
// kernel: tpu_custom_call.1
= control target key start
LH: loop header
LB: loop body
LE: loop exit
PB: predicated region body
PF: predicated region fallthrough
CT: control target
= control target key end

     0   :  { %7 = vsyncpa [#allocation3], 0  ;;  %s1424_s0 = inlined_call_operand.vmem [shape: f32[2,2,4,180], index: 0, kind: input, shape index: {}]   ;;  %s1425_s1 = inlined_call_operand.vmem [shape: f32[88,4], index: 1, kind: input, shape index: {}]   ;;  %s1426_s2 = inlined_call_operand.hbm [shape: f32[2,8,256], index: 2, kind: output, shape index: {}]  }
   0x1   :  { %9 = vsyncpa [#allocation3 + $0x1], 0  ;;  %s1071_s9 = smov 0   ;;  %s1073_s10 = smov 0  }
   0x2   :  { %s1075_s11 = smov 0   ;;  %s1077_s12 = smov 0  }
   0x3   :  { %s1079_s13 = smov 0   ;;  %s1081_s14 = smov 0  }
   0x4   :  { %s1083_s15 = smov 0   ;;  %s1085_s16 = smov 0  }
   0x5 LB: > { %s786_s17 = sadd.s32 4294967295, %s1037_s16   ;;  %s787_s18 = sadd.s32 4294967294, %s1037_s16   ;;  %s1037_s16 = sphi %s1085_s16, %s15_s16   ;;  %s1033_s15 = sphi %s1083_s15, %s1435_s15   ;;  %s1029_s14 = sphi %s1081_s14, %s1434_s14   ;;  %s1025_s13 = sphi %s1079_s13, %s1433_s13   ;;  %s1021_s12 = sphi %s1077_s12, %s1432_s12   ;;  %s1017_s11 = sphi %s1075_s11, %s1431_s11   ;;  %s1013_s10 = sphi %s1073_s10, %s1430_s10   ;;  %s1009_s9 = sphi %s1071_s9, %s1429_s9  }
   0x6   : > { %s24_s19 = sadd.s32 1, %s1029_s14  ;;  %s27_s20 = sadd.s32 1, %s1033_s15 }
   0x7   : > { %p25_p0 = scmp.ge.s32.totalorder %s24_s19, 2  ;;  %p95_p1 = scmp.ne.s32.totalorder %s1017_s11, %s1013_s10 }
   0x8   : > { %p96_p2 = scmp.eq.s32.totalorder %s786_s17, 3  ;;  %p101_p5 = scmp.ne.s32.totalorder %s1013_s10, %s1009_s9 }
   0x9   : > { %s1437_s19 = smov (%p25_p0, %s24_s19), 0  ;;  %s1439_s20 = smov (!%p25_p0, %s27_s20), %s1033_s15 }
   0xa   : > { %s81_s21 = ssub.s32 %s1029_s14, %s1437_s19  ;;  %p1122_p3 = por %p96_p2, %p95_p1 }
   0xb   : > { %p29_p4 = scmp.ge.s32.totalorder %s1439_s20, 2  ;;  %p102_p6 = scmp.eq.s32.totalorder %s787_s18, 3 }
   0xc   : > { %p790_p7 = scmp.ge.s32.totalorder %s1037_s16, 1  ;;  %p135_p9 = scmp.lt.s32.totalorder %s1037_s16, 5 }
   0xd   : > { %s1441_s20 = smov (%p29_p4, %s1439_s20), 0  ;;  %p1131_p8 = por %p102_p6, %p101_p5 }
   0xe   : > { %s80_s24 = ssub.s32 %s1033_s15, %s1441_s20  ;;  %s85_s25 = sadd.s32 1, %s1017_s11 }
   0xf   : > { %s82_s26 = sor.u32 %s81_s21, %s80_s24  ;;  %p136_p10 = pnand %p790_p7, %p135_p9 }
  0x10   : > { %p83_p11 = scmp.eq.s32.totalorder %s82_s26, 0  ;;  %p161_p12 = scmp.lt.s32.totalorder (!%p136_p10), %s1025_s13, 1  ;;  %v1039_v0 = vmov (!%p136_p10), 0.0   ;;  %vm218_vm0 = vcmask (!%p136_p10), 1043456   ;;  %v171_v3 = vld [vmem:[%s1425_s1] sm:$0xff] (!%p136_p10)  ;;  %vm184_vm1 = vcmask (!%p136_p10), 31744  }
  0x11   : > { %139 = sbr.rel (%p136_p10) target bundleno = 603 (0x25b), region = 28  ;;  %p163_p13 = scmp.lt.s32.totalorder (!%p136_p10), %s1021_s12, 1  ;;  %287 = vmatprep.mubr.f32.mxu0 (!%p136_p10), %v1039_v0  ;;  %323 = vmatprep.mubr.f32.mxu1 (!%p136_p10), %v1039_v0  ;;  %v177_v4 = vld [vmem:[%s1425_s1 + $0x30] sm:$0xff] (!%p136_p10)  ;;  %v172_v5 = vld [vmem:[%s1425_s1 + $0x8] sm:$0xff] (!%p136_p10)  ;;  %v178_v6 = vld [vmem:[%s1425_s1 + $0x38] sm:$0xff] (!%p136_p10)  ;;  %vm360_vm2 = vcmask (!%p136_p10), 154624  }
  0x12   : > { %s1140_s27 = scalar_select %p83_p11, %s1017_s11, %s85_s25  }
  0x13   : > { %v173_v7 = vld [vmem:[%s1425_s1 + $0x10] sm:$0xff] (!%p136_p10)  ;;  %v179_v8 = vld [vmem:[%s1425_s1 + $0x40] sm:$0xff] (!%p136_p10)  ;;  %v174_v9 = vld [vmem:[%s1425_s1 + $0x18] sm:$0xff] (!%p136_p10)  ;;  %s1045_s6 = smov (!%p136_p10), 111   ;;  %s1046_s7 = smov (!%p136_p10), 110   ;;  %vm370_vm3 = vcmask (!%p136_p10), 146432  }
  0x14   : > { %v180_v10 = vld [vmem:[%s1425_s1 + $0x48] sm:$0xff] (!%p136_p10)  ;;  %v175_v11 = vld [vmem:[%s1425_s1 + $0x20] sm:$0xff] (!%p136_p10)  ;;  %v181_v12 = vld [vmem:[%s1425_s1 + $0x50] sm:$0xff] (!%p136_p10)  ;;  %vm410_vm4 = vcmask (!%p136_p10), 1039360   ;;  %vm394_vm5 = vcmask (!%p136_p10), 7168   ;;  %vm382_vm6 = vcmask (!%p136_p10), 138240  }
  0x15   : > { %v176_v13 = vld [vmem:[%s1425_s1 + $0x28] sm:$0xff] (!%p136_p10)  ;;  %vm422_vm7 = vcmask (!%p136_p10), 908288   ;;  %vm434_vm8 = vcmask (!%p136_p10), 900096   ;;  %vm446_vm9 = vcmask (!%p136_p10), 891904   ;;  %s1048_s17 = smov (!%p136_p10), 107   ;;  %s1049_s18 = smov (!%p136_p10), 103  }
  0x16   : > { %s1050_s21 = smov (!%p136_p10), 105   ;;  %s1051_s24 = smov (!%p136_p10), 99   ;;  %vm674_vm10 = vcmask (!%p136_p10), 130048   ;;  %vm676_vm11 = vcmask (!%p136_p10), 261120   ;;  %vm678_vm12 = vcmask (!%p136_p10), 392192   ;;  %vm680_vm13 = vcmask (!%p136_p10), 523264  }
  0x17   : > { %s1052_s25 = smov (!%p136_p10), 101   ;;  %s1053_s26 = smov (!%p136_p10), 97   ;;  %vm668_vm14 = vcmask (!%p136_p10), 793600   ;;  %vm682_vm15 = vcmask (!%p136_p10), 654336  }
  0x18   : > { %s162_s28 = scalar_select %p161_p12, %s1025_s13, 1 }
  0x19   : > { %s164_s29 = scalar_select %p163_p13, %s1021_s12, 1 }
  0x1a   : > { %s793_s30 = sshll.u32 %s162_s28, 2  ;;  %s1054_s28 = smov 95  }
  0x1b   : > { %s792_s3 = sshll.u32 %s164_s29, 1  ;;  %s1040_s29 = smov 17  }
  0x1c   : > { %s167_s4 = sadd.s32 %s793_s30, %s792_s3  ;;  %s1041_s30 = smov 19  }
  0x1d   : > { %s794_s5 = sshll.u32 %s167_s4, 2  ;;  %s1042_s3 = smov 1  }
  0x1e   : > { %s169_s8 = scalar_lea.vmem %s1424_s0, %s794_s5  ;;  %s1043_s4 = smov 18  }
  0x1f   : > { %v170_v1 = vld [vmem:[%s169_s8] sm:$0xff]  ;;  %s1044_s5 = smov 127   ;;  %s1047_s8 = smov 109  }
  0x20   : > { %v183_v2 = vcombine.high %v170_v1, %v170_v1 }
  0x22   : > { %795 = vmatprep.subr.msk.mxu0 %vm218_vm0, %v183_v2  ;;  %813 = vmatprep.subr.msk.mxu1 %vm218_vm0, %v183_v2 }
  0x23   : > { %796 = vmatpush1.msk.msra.mxu0 %vm218_vm0, %v170_v1  ;;  %814 = vmatpush1.msk.msra.mxu1 %vm218_vm0, %v170_v1  ;;  %vm684_vm0 = vcmask 785408  }
  0x24   : > { %797 = vmatmul.mubr.msk.f32.vlgmr.msra.gmra.mrb[0].mxu0 %vm184_vm1, %v171_v3  ;;  %803 = vmatmul.mubr.msk.f32.vlgmr.msra.gmra.mrb[0].mxu1 %vm184_vm1, %v177_v4 }
  0x25   : > { %293 = vmatprep.mubr.f32.mxu0 %v1039_v0  ;;  %329 = vmatprep.mubr.f32.mxu1 %v1039_v0 }
  0x28   : > { %798 = vmatmul.mubr.msk.f32.gmra.mrb[2].mxu0 %vm184_vm1, %v172_v5  ;;  %804 = vmatmul.mubr.msk.f32.gmra.mrb[2].mxu1 %vm184_vm1, %v178_v6 }
  0x29   : > { %299 = vmatprep.mubr.f32.mxu0 %v1039_v0  ;;  %335 = vmatprep.mubr.f32.mxu1 %v1039_v0 }
  0x2c   : > { %799 = vmatmul.mubr.msk.f32.gmra.mrb[4].mxu0 %vm184_vm1, %v173_v7  ;;  %805 = vmatmul.mubr.msk.f32.gmra.mrb[4].mxu1 %vm184_vm1, %v179_v8 }
  0x2d   : > { %305 = vmatprep.mubr.f32.mxu0 %v1039_v0  ;;  %341 = vmatprep.mubr.f32.mxu1 %v1039_v0 }
  0x30   : > { %800 = vmatmul.mubr.msk.f32.gmra.mrb[6].mxu0 %vm184_vm1, %v174_v9  ;;  %806 = vmatmul.mubr.msk.f32.gmra.mrb[6].mxu1 %vm184_vm1, %v180_v10 }
  0x31   : > { %311 = vmatprep.mubr.f32.mxu0 %v1039_v0  ;;  %347 = vmatprep.mubr.f32.mxu1 %v1039_v0 }
  0x34   : > { %801 = vmatmul.mubr.msk.f32.gmra.mrb[8].mxu0 %vm184_vm1, %v175_v11  ;;  %807 = vmatmul.mubr.msk.f32.gmra.mrb[8].mxu1 %vm184_vm1, %v181_v12 }
  0x35   : > { %317 = vmatprep.mubr.f32.mxu0 %v1039_v0 }
  0x38   : > { %802 = vmatmul.mubr.msk.f32.gmra.mrb[10].mxu0 %vm184_vm1, %v176_v13  ;;  %vm686_vm1 = vcmask 916480  }
  0xf7   : > { %v1193_v14 = vpop.f32.mrb[0].mxu0  ;;  %v1195_v15 = vpop.f32.mrb[0].mxu1 }
  0xf8   : > { %v1197_v16 = vpop.f32.mrb[1].mxu0  ;;  %v1199_v17 = vpop.f32.mrb[1].mxu1 }
  0xfb   : > { %v295_v18 = vpop.f32.mrb[2].mxu0  ;;  %v331_v19 = vpop.f32.mrb[2].mxu1 }
  0xfc   : > { %378 = vrot.lane.b32.xlu1 %v295_v18, %s1040_s29  ;;  %356 = vrot.lane.b32.xlu0 %v295_v18, %s1041_s30  ;;  %v297_v20 = vpop.f32.mrb[3].mxu0  ;;  %v333_v21 = vpop.f32.mrb[3].mxu1  ;;  %v1204_v22 = vmul.f32 %v295_v18, %v1193_v14 }
  0xfd   : > { %v1207_v23 = vmul.f32 %v297_v20, %v1197_v16 }
  0xff   : > { %v301_v24 = vpop.f32.mrb[4].mxu0  ;;  %v337_v25 = vpop.f32.mrb[4].mxu1 }
 0x100   : > { %390 = vrot.lane.b32.xlu1 %v295_v18, %s1042_s3  ;;  %366 = vrot.lane.b32.xlu0 %v295_v18, %s1043_s4  ;;  %v303_v26 = vpop.f32.mrb[5].mxu0  ;;  %v339_v27 = vpop.f32.mrb[5].mxu1 }
 0x103   : > { %v307_v28 = vpop.f32.mrb[6].mxu0  ;;  %v343_v29 = vpop.f32.mrb[6].mxu1 }
 0x104   : > { %406 = vrot.lane.b32.xlu0 %v295_v18, %s1044_s5  ;;  %358 = vrot.lane.b32.xlu1 %v297_v20, %s1041_s30  ;;  %v309_v30 = vpop.f32.mrb[7].mxu0  ;;  %v345_v31 = vpop.f32.mrb[7].mxu1 }
 0x107   : > { %v313_v32 = vpop.f32.mrb[8].mxu0  ;;  %v349_v33 = vpop.f32.mrb[8].mxu1 }
 0x108   : > { %418 = vrot.lane.b32.xlu0 %v295_v18, %s1045_s6  ;;  %392 = vrot.lane.b32.xlu1 %v297_v20, %s1042_s3  ;;  %v315_v34 = vpop.f32.mrb[9].mxu0  ;;  %v351_v35 = vpop.f32.mrb[9].mxu1 }
 0x10b   : > { %v319_v36 = vpop.f32.mrb[10].mxu0 }
 0x10c   : > { %368 = vrot.lane.b32.xlu0 %v297_v20, %s1043_s4  ;;  %408 = vrot.lane.b32.xlu1 %v297_v20, %s1044_s5  ;;  %v321_v37 = vpop.f32.mrb[11].mxu0 }
 0x110   : > { %380 = vrot.lane.b32.xlu0 %v297_v20, %s1040_s29  ;;  %420 = vrot.lane.b32.xlu1 %v297_v20, %s1045_s6 }
 0x114   : > { %430 = vrot.lane.b32.xlu0 %v295_v18, %s1046_s7  ;;  %432 = vrot.lane.b32.xlu1 %v297_v20, %s1046_s7 }
 0x118   : > { %442 = vrot.lane.b32.xlu0 %v295_v18, %s1047_s8  ;;  %444 = vrot.lane.b32.xlu1 %v297_v20, %s1047_s8 }
 0x11c   : > { %560 = vrot.lane.b32.xlu0 %v331_v19, %s1044_s5  ;;  %562 = vrot.lane.b32.xlu1 %v333_v21, %s1044_s5 }
 0x120   : > { %464 = vrot.lane.b32.xlu0 %v301_v24, %s1041_s30  ;;  %466 = vrot.lane.b32.xlu1 %v303_v26, %s1041_s30 }
 0x124   : > { %581 = vrot.lane.b32.xlu0 %v337_v25, %s1045_s6  ;;  %583 = vrot.lane.b32.xlu1 %v339_v27, %s1045_s6 }
 0x128   : > { %485 = vrot.lane.b32.xlu1 %v307_v28, %s1043_s4  ;;  %487 = vrot.lane.b32.xlu0 %v309_v30, %s1043_s4 }
 0x12c   : > { %506 = vrot.lane.b32.xlu0 %v313_v32, %s1040_s29  ;;  %527 = vrot.lane.b32.xlu1 %v319_v36, %s1042_s3 }
 0x130   : > { %508 = vrot.lane.b32.xlu0 %v315_v34, %s1040_s29  ;;  %529 = vrot.lane.b32.xlu1 %v321_v37, %s1042_s3  ;;  %s158_s29 = sand.u32 1, %s1013_s10   ;;  %s809_s3 = sshll.u32 %s1025_s13, 1 }
 0x131   : > { %s791_s30 = sshll.u32 %s158_s29, 3  ;;  %s701_s4 = sadd.s32 %s1021_s12, %s809_s3 }
 0x132   : > { %s810_s5 = sshll.u32 %s701_s4, 7  ;;  %s160_s6 = scalar_lea.vmem [#allocation2], %s791_s30 }
 0x133   : > { %s1369_s12 = scalar_lea.hbm %s1426_s2, %s810_s5 }
 0x134   : > { %602 = vrot.lane.b32.xlu0 %v343_v29, %s1046_s7  ;;  %604 = vrot.lane.b32.xlu1 %v345_v31, %s1046_s7  ;;  %s705_s7 = sshll.u32 %s160_s6, 4  ;;  %s1371_s7 = int_to_ptr.vmem [resolvable:$true] %s705_s7 }
 0x138   : > { %623 = vrot.lane.b32.xlu0 %v349_v33, %s1047_s8  ;;  %625 = vrot.lane.b32.xlu1 %v351_v35, %s1047_s8 }
 0x16e   : > { %v379_v38 = vpop.permute.xlu1 %378  ;;  %v357_v39 = vpop.permute.xlu0 %356 }
 0x16f   : > { %v1228_v42 = vmul.f32 %v357_v39, %v1193_v14  ;;  %v1234_v44 = vmul.f32 %v379_v38, %v1193_v14 }
 0x172   : > { %v391_v40 = vpop.permute.xlu1 %390  ;;  %v367_v41 = vpop.permute.xlu0 %366 }
 0x173   : > { %v1231_v43 = vmul.f32 %v367_v41, %v1193_v14  ;;  %v1239_v48 = vmul.f32 %v391_v40, %v1193_v14 }
 0x175   : > { %v376_v45 = vmax.f32 %v1228_v42, %v1231_v43 }
 0x176   : > { %v407_v46 = vpop.permute.xlu0 %406  ;;  %v359_v47 = vpop.permute.xlu1 %358 }
 0x177   : > { %v388_v49 = vmax.f32 %v376_v45, %v1234_v44  ;;  %v361_v56 = vsel %vm360_vm2, %v357_v39, %v359_v47 }
 0x178   : > { %v365_v61 = vmul.f32 %v361_v56, %v1197_v16 }
 0x179   : > { %v400_v50 = vmax.f32 %v388_v49, %v1239_v48 }
 0x17a   : > { %v419_v51 = vpop.permute.xlu0 %418  ;;  %v393_v52 = vpop.permute.xlu1 %392 }
 0x17b   : > { %v404_v53 = vmax.f32 %v400_v50, %v1204_v22  ;;  %v395_v1 = vsel %vm394_vm5, %v391_v40, %v393_v52 }
 0x17c   : > { %v1263_v7 = vmul.f32 %v395_v1, %v1197_v16 }
 0x17e   : > { %v369_v54 = vpop.permute.xlu0 %368  ;;  %v409_v55 = vpop.permute.xlu1 %408 }
 0x17f   : > { %v371_v57 = vsel %vm370_vm3, %v367_v41, %v369_v54  ;;  %v411_v58 = vsel %vm410_vm4, %v407_v46, %v409_v55  ;;  %v1273_v19 = vmul.f32 %v409_v55, %v1197_v16 }
 0x180   : > { %v1248_v59 = vmul.f32 %v371_v57, %v1197_v16  ;;  %v414_v60 = vmul.f32 %v411_v58, %v1193_v14 }
 0x182   : > { %v416_v62 = vmax.f32 %v404_v53, %v414_v60  ;;  %v381_v63 = vpop.permute.xlu0 %380  ;;  %v421_v0 = vpop.permute.xlu1 %420  ;;  %v377_v4 = vmax.f32 %v365_v61, %v1248_v59 }
 0x183   : > { %v383_v2 = vsel %vm382_vm6, %v379_v38, %v381_v63  ;;  %v423_v3 = vsel %vm422_vm7, %v419_v51, %v421_v0  ;;  %v1280_v28 = vmul.f32 %v421_v0, %v1197_v16 }
 0x184   : > { %v1257_v5 = vmul.f32 %v383_v2, %v1197_v16  ;;  %v1260_v6 = vmul.f32 %v423_v3, %v1193_v14 }
 0x186   : > { %v389_v8 = vmax.f32 %v377_v4, %v1257_v5  ;;  %v428_v9 = vmax.f32 %v416_v62, %v1260_v6  ;;  %v431_v10 = vpop.permute.xlu0 %430  ;;  %v433_v11 = vpop.permute.xlu1 %432 }
 0x187   : > { %v435_v12 = vsel %vm434_vm8, %v431_v10, %v433_v11  ;;  %v1285_v31 = vmul.f32 %v433_v11, %v1197_v16 }
 0x188   : > { %v401_v13 = vmax.f32 %v389_v8, %v1263_v7  ;;  %v1270_v18 = vmul.f32 %v435_v12, %v1193_v14 }
 0x18a   : > { %v405_v20 = vmax.f32 %v401_v13, %v1207_v23  ;;  %v440_v21 = vmax.f32 %v428_v9, %v1270_v18  ;;  %v443_v24 = vpop.permute.xlu0 %442  ;;  %v445_v25 = vpop.permute.xlu1 %444 }
 0x18b   : > { %v447_v26 = vsel %vm446_vm9, %v443_v24, %v445_v25  ;;  %v1294_v35 = vmul.f32 %v445_v25, %v1197_v16 }
 0x18c   : > { %v417_v27 = vmax.f32 %v405_v20, %v1273_v19  ;;  %v450_v29 = vmul.f32 %v447_v26, %v1193_v14 }
 0x18e   : > { %v429_v30 = vmax.f32 %v417_v27, %v1280_v28  ;;  %v1287_v32 = vmax.f32 %v440_v21, %v450_v29  ;;  %v1289_v33 = vpop.permute.xlu0 %560  ;;  %v1291_v34 = vpop.permute.xlu1 %562 }
 0x190   : > { %v441_v36 = vmax.f32 %v429_v30, %v1285_v31  ;;  %v613_v37 = vsub.f32 %v450_v29, %v1287_v32  ;;  %v550_v14 = vsub.f32 %v414_v60, %v1287_v32  ;;  %v454_v38 = vsub.f32 %v1228_v42, %v1287_v32 }
 0x191   : > { %v571_v39 = vsub.f32 %v1260_v6, %v1287_v32  ;;  %v475_v40 = vsub.f32 %v1231_v43, %v1287_v32  ;;  %v496_v41 = vsub.f32 %v1234_v44, %v1287_v32  ;;  %v517_v16 = vsub.f32 %v1239_v48, %v1287_v32 }
 0x192   : > { %v1310_v45 = vmax.f32 %v441_v36, %v1294_v35  ;;  %v465_v46 = vpop.permute.xlu0 %464  ;;  %v467_v47 = vpop.permute.xlu1 %466  ;;  %v456_v50 = vmul.f32 1.442695, %v454_v38  ;;  %v552_v54 = vmul.f32 1.442695, %v550_v14  ;;  %v538_v56 = vsub.f32 %v1204_v22, %v1287_v32 }
 0x193   : > { %v477_v55 = vmul.f32 1.442695, %v475_v40  ;;  %v498_v22 = vmul.f32 1.442695, %v496_v41  ;;  %v519_v1 = vmul.f32 1.442695, %v517_v16  ;;  %v468_v13 = vsel %vm360_vm2, %v465_v46, %v467_v47 }
 0x194   : > { %v614_v42 = vsub.f32 %v1294_v35, %v1310_v45  ;;  %v551_v49 = vsub.f32 %v1273_v19, %v1310_v45  ;;  %v455_v43 = vsub.f32 %v365_v61, %v1310_v45  ;;  %v572_v44 = vsub.f32 %v1280_v28, %v1310_v45 }
 0x195   : > { %v476_v48 = vsub.f32 %v1248_v59, %v1310_v45  ;;  %903 = vpow2.f32 %v456_v50  ;;  %v497_v57 = vsub.f32 %v1257_v5, %v1310_v45  ;;  %v518_v58 = vsub.f32 %v1263_v7, %v1310_v45 }
 0x196   : > { %v458_v51 = vmul.f32 1.442695, %v455_v43  ;;  %v1321_v52 = vpop.permute.xlu0 %581  ;;  %v1323_v53 = vpop.permute.xlu1 %583  ;;  %v539_v59 = vsub.f32 %v1207_v23, %v1310_v45  ;;  %v592_v61 = vsub.f32 %v1270_v18, %v1287_v32  ;;  %v593_v62 = vsub.f32 %v1285_v31, %v1310_v45 }
 0x197   : > { %v479_v60 = vmul.f32 1.442695, %v476_v48  ;;  %v540_v2 = vmul.f32 1.442695, %v538_v56  ;;  %v500_v3 = vmul.f32 1.442695, %v497_v57 }
 0x198   : > { %905 = vpow2.f32 %v458_v51  ;;  %v521_v23 = vmul.f32 1.442695, %v518_v58  ;;  %v542_v6 = vmul.f32 1.442695, %v539_v59  ;;  %v573_v7 = vmul.f32 1.442695, %v571_v39 }
 0x199   : > { %907 = vpow2.f32 %v552_v54  ;;  %v554_v8 = vmul.f32 1.442695, %v551_v49  ;;  %v615_v10 = vmul.f32 1.442695, %v613_v37  ;;  %v575_v18 = vmul.f32 1.442695, %v572_v44 }
 0x19a   : > { %v486_v63 = vpop.permute.xlu1 %485  ;;  %v488_v0 = vpop.permute.xlu0 %487  ;;  %909 = vpow2.f32 %v477_v55  ;;  %v594_v20 = vmul.f32 1.442695, %v592_v61  ;;  %v596_v28 = vmul.f32 1.442695, %v593_v62  ;;  %v617_v14 = vmul.f32 1.442695, %v614_v42 }
 0x19b   : > { %911 = vpow2.f32 %v479_v60  ;;  %v489_v25 = vsel %vm370_vm3, %v486_v63, %v488_v0  ;;  %v564_v54 = vsel %vm410_vm4, %v1289_v33, %v1291_v34  ;;  %v585_v58 = vsel %vm422_vm7, %v1321_v52, %v1323_v53 }
 0x19c   : > { %913 = vpow2.f32 %v498_v22 }
 0x19d   : > { %915 = vpow2.f32 %v519_v1 }
 0x19e   : > { %v507_v4 = vpop.permute.xlu0 %506  ;;  %v528_v5 = vpop.permute.xlu1 %527  ;;  %917 = vpow2.f32 %v540_v2 }
 0x19f   : > { %919 = vpow2.f32 %v500_v3  ;;  %v904_v9 = vpop.eup %903 }
 0x1a0   : > { %921 = vpow2.f32 %v521_v23  ;;  %v471_v24 = vmul.f32 %v904_v9, %v465_v46 }
 0x1a1   : > { %923 = vpow2.f32 %v542_v6 }
 0x1a2   : > { %v509_v11 = vpop.permute.xlu0 %508  ;;  %v530_v12 = vpop.permute.xlu1 %529  ;;  %925 = vpow2.f32 %v573_v7 }
 0x1a3   : > { %v906_v19 = vpop.eup %905  ;;  %927 = vpow2.f32 %v554_v8  ;;  %v510_v47 = vsel %vm382_vm6, %v507_v4, %v509_v11  ;;  %v531_v43 = vsel %vm394_vm5, %v528_v5, %v530_v12 }
 0x1a4   : > { %v908_v21 = vpop.eup %907  ;;  %929 = vpow2.f32 %v615_v10  ;;  %v472_v27 = vmul.f32 %v906_v19, %v468_v13 }
 0x1a5   : > { %v910_v26 = vpop.eup %909  ;;  %931 = vpow2.f32 %v575_v18  ;;  %v567_v33 = vmul.f32 %v908_v21, %v564_v54 }
 0x1a6   : > { %v912_v29 = vpop.eup %911  ;;  %v481_v30 = vadd.f32 %v910_v26, %v904_v9  ;;  %v492_v31 = vmul.f32 %v910_v26, %v486_v63  ;;  %v603_v32 = vpop.permute.xlu0 %602  ;;  %933 = vpow2.f32 %v594_v20 }
 0x1a7   : > { %v1339_v36 = vpop.permute.xlu1 %604  ;;  %v914_v37 = vpop.eup %913  ;;  %v493_v38 = vmul.f32 %v912_v29, %v489_v25  ;;  %v482_v39 = vadd.f32 %v912_v29, %v906_v19  ;;  %935 = vpow2.f32 %v596_v28 }
 0x1a8   : > { %v916_v40 = vpop.eup %915  ;;  %v494_v41 = vadd.f32 %v492_v31, %v471_v24  ;;  %v502_v16 = vadd.f32 %v914_v37, %v481_v30  ;;  %v513_v46 = vmul.f32 %v914_v37, %v507_v4  ;;  %937 = vpow2.f32 %v617_v14 }
 0x1a9   : > { %v918_v49 = vpop.eup %917  ;;  %v495_v50 = vadd.f32 %v493_v38, %v472_v27  ;;  %v534_v35 = vmul.f32 %v916_v40, %v528_v5  ;;  %v606_v6 = vsel %vm434_vm8, %v603_v32, %v1339_v36 }
 0x1aa   : > { %v920_v44 = vpop.eup %919  ;;  %v515_v48 = vadd.f32 %v513_v46, %v494_v41  ;;  %v546_v51 = vmul.f32 %v918_v49, %v1195_v15  ;;  %v523_v45 = vadd.f32 %v916_v40, %v502_v16  ;;  %v624_v59 = vpop.permute.xlu0 %623 }
 0x1ab   : > { %v922_v42 = vpop.eup %921  ;;  %v514_v55 = vmul.f32 %v920_v44, %v510_v47  ;;  %v503_v56 = vadd.f32 %v920_v44, %v482_v39  ;;  %v626_v62 = vpop.permute.xlu1 %625 }
 0x1ac   : > { %v924_v57 = vpop.eup %923  ;;  %v536_v60 = vadd.f32 %v534_v35, %v515_v48  ;;  %v544_v61 = vadd.f32 %v918_v49, %v523_v45  ;;  %v535_v22 = vmul.f32 %v922_v42, %v531_v43  ;;  %v627_v52 = vsel %vm446_vm9, %v624_v59, %v626_v62 }
 0x1ad   : > { %v926_v15 = vpop.eup %925  ;;  %v516_v63 = vadd.f32 %v514_v55, %v495_v50  ;;  %v547_v0 = vmul.f32 %v924_v57, %v1199_v17  ;;  %v524_v1 = vadd.f32 %v922_v42, %v503_v56 }
 0x1ae   : > { %v928_v2 = vpop.eup %927  ;;  %v548_v3 = vadd.f32 %v546_v51, %v536_v60  ;;  %v556_v4 = vadd.f32 %v908_v21, %v544_v61  ;;  %v588_v9 = vmul.f32 %v926_v15, %v585_v58 }
 0x1af   : > { %v930_v5 = vpop.eup %929  ;;  %v537_v23 = vadd.f32 %v535_v22, %v516_v63  ;;  %v545_v7 = vadd.f32 %v924_v57, %v524_v1  ;;  %v568_v17 = vmul.f32 %v928_v2, %v1291_v34 }
 0x1b0   : > { %v932_v8 = vpop.eup %931  ;;  %v569_v10 = vadd.f32 %v567_v33, %v548_v3  ;;  %v577_v11 = vadd.f32 %v926_v15, %v556_v4  ;;  %v630_v24 = vmul.f32 %v930_v5, %v627_v52 }
 0x1b1   : > { %v934_v12 = vpop.eup %933  ;;  %v549_v13 = vadd.f32 %v547_v0, %v537_v23  ;;  %v557_v18 = vadd.f32 %v928_v2, %v545_v7  ;;  %v589_v26 = vmul.f32 %v932_v8, %v1323_v53 }
 0x1b2   : > { %v590_v19 = vadd.f32 %v588_v9, %v569_v10  ;;  %v609_v20 = vmul.f32 %v934_v12, %v606_v6  ;;  %v598_v21 = vadd.f32 %v934_v12, %v577_v11  ;;  %v936_v25 = vpop.eup %935 }
 0x1b3   : > { %v570_v27 = vadd.f32 %v568_v17, %v549_v13  ;;  %v578_v28 = vadd.f32 %v932_v8, %v557_v18  ;;  %v610_v32 = vmul.f32 %v936_v25, %v1339_v36  ;;  %v938_v14 = vpop.eup %937 }
 0x1b4   : > { %v611_v29 = vadd.f32 %v609_v20, %v590_v19  ;;  %v619_v30 = vadd.f32 %v930_v5, %v598_v21  ;;  %v631_v39 = vmul.f32 %v938_v14, %v626_v62 }
 0x1b5   : > { %v591_v31 = vadd.f32 %v589_v26, %v570_v27  ;;  %v599_v37 = vadd.f32 %v936_v25, %v578_v28 }
 0x1b6   : > { %939 = vrcp.f32 %v619_v30  ;;  %v632_v34 = vadd.f32 %v630_v24, %v611_v29 }
 0x1b7   : > { %v612_v38 = vadd.f32 %v610_v32, %v591_v31  ;;  %v620_v40 = vadd.f32 %v938_v14, %v599_v37 }
 0x1b9   : > { %v633_v41 = vadd.f32 %v631_v39, %v612_v38  ;;  %941 = vrcp.f32 %v620_v40 }
 0x1c0   : > { %v940_v16 = vpop.eup %939 }
 0x1c1   : > { %v636_v46 = vmul.f32 %v940_v16, %v619_v30 }
 0x1c3   : > { %v942_v47 = vpop.eup %941  ;;  %v638_v53 = vsub.f32 2.0, %v636_v46 }
 0x1c4   : > { %v637_v49 = vmul.f32 %v942_v47, %v620_v40 }
 0x1c5   : > { %v640_v50 = vmul.f32 %v940_v16, %v638_v53 }
 0x1c6   : > { %v639_v43 = vsub.f32 2.0, %v637_v49 }
 0x1c7   : > { %v642_v44 = vmul.f32 %v640_v50, %v632_v34 }
 0x1c8   : > { %v641_v48 = vmul.f32 %v942_v47, %v639_v43 }
 0x1c9   : > { %648 = vrot.lane.b32.xlu1 %v642_v44, %s1048_s17  ;;  %645 = vrot.lane.b32.xlu0 %v642_v44, %s1047_s8  ;;  %s690_s17 = scalar_lea.sflag [#allocation3], %s158_s29 }
 0x1ca   : > { %v643_v36 = vmul.f32 %v641_v48, %v633_v41 }
 0x1cd   : > { %654 = vrot.lane.b32.xlu1 %v642_v44, %s1049_s18  ;;  %651 = vrot.lane.b32.xlu0 %v642_v44, %s1050_s21  ;;  %s943_s18 = scalar_lea.vmem %s1371_s7, 128  ;;  %s1055_s21 = smov [#allocation2]  }
 0x1ce   : > { %p944_p0 = scmp.ne.s32.totalorder %s1371_s7, %s943_s18 }
 0x1d0   : > { %p945_p1 = pnand %p944_p0, %p1122_p3 }
 0x1d1   : > { %660 = vrot.lane.b32.xlu1 %v642_v44, %s1051_s24  ;;  %657 = vrot.lane.b32.xlu0 %v642_v44, %s1052_s25  ;;  %s947_s24 = sshll.u32 %s1055_s21, 4  ;;  %s948_s24 = int_to_ptr.vmem [resolvable:$false] %s947_s24 }
 0x1d2   : > { %p946_p2 = pneg %p945_p1  ;;  %s949_s25 = scalar_lea.vmem %s948_s24, 256 }
 0x1d3   : > { %p950_p4 = scmp.lt.s32.totalorder %s1371_s7, %s948_s24  ;;  %p951_p5 = scmp.lt.s32.totalorder %s949_s25, %s943_s18 }
 0x1d5   : > { %666 = vrot.lane.b32.xlu1 %v643_v36, %s1053_s26  ;;  %664 = vrot.lane.b32.xlu0 %v642_v44, %s1053_s26  ;;  %p952_p6 = por %p951_p5, %p950_p4 }
 0x1d7   : > { %p953_p7 = pnand %p952_p6, %p946_p2 }
 0x1d9   : > { %671 = vrot.lane.b32.xlu0 %v643_v36, %s1054_s28 }
 0x23b   : > { %v649_v51 = vpop.permute.xlu1 %648  ;;  %v646_v35 = vpop.permute.xlu0 %645 }
 0x23c   : > { %v675_v54 = vsel %vm674_vm10, %v646_v35, %v649_v51 }
 0x23f   : > { %v655_v45 = vpop.permute.xlu1 %654  ;;  %v652_v42 = vpop.permute.xlu0 %651 }
 0x240   : > { %v677_v55 = vsel %vm676_vm11, %v675_v54, %v652_v42 }
 0x241   : > { %v679_v58 = vsel %vm678_vm12, %v677_v55, %v655_v45 }
 0x243   : > { %v661_v56 = vpop.permute.xlu1 %660  ;;  %v658_v57 = vpop.permute.xlu0 %657 }
 0x244   : > { %v681_v60 = vsel %vm680_vm13, %v679_v58, %v658_v57 }
 0x245   : > { %v683_v15 = vsel %vm682_vm15, %v681_v60, %v661_v56 }
 0x247   : > { %v667_v59 = vpop.permute.xlu1 %666  ;;  %v665_v61 = vpop.permute.xlu0 %664 }
 0x248   : > { %v669_v62 = vsel %vm668_vm14, %v665_v61, %v667_v59 }
 0x249   : > { %v685_v63 = vsel %vm684_vm0, %v683_v15, %v669_v62 }
 0x24b   : > { %v672_v0 = vpop.permute.xlu0 %671 }
 0x24c   : > { %v687_v22 = vsel %vm686_vm1, %v685_v63, %v672_v0 }
 0x24d   : > { %688 = vst [vmem:[%s160_s6] sm:$0xff] %v687_v22 }
 0x24e   : > { %956 = shalt.err (!%p953_p7)
}
 0x24f   : > { %s957_s26 = scalar_lea.hbm %s1369_s12, 128  ;;  %s961_s30 = scalar_lea.hbm %s1426_s2, 512 }
 0x250   : > { %p958_p9 = scmp.ne.s32.totalorder %s1369_s12, %s957_s26  ;;  %p962_p12 = scmp.lt.u32.totalorder %s1369_s12, %s1426_s2 }
 0x251   : > { %p963_p13 = scmp.lt.u32.totalorder %s961_s30, %s957_s26  ;;  %p965_p1 = scmp.lt.u32.totalorder %s957_s26, %s1369_s12 }
 0x252   : > { %p959_p10 = pnand %p958_p9, %p1122_p3 }
 0x253   : > { %p964_p0 = por %p963_p13, %p962_p12 }
 0x254   : > { %p960_p11 = pneg %p959_p10 }
 0x255   : > { %p966_p2 = por %p965_p1, %p964_p0 }
 0x257   : > { %p967_p4 = pnand %p966_p2, %p960_p11 }
 0x259   : > { %970 = shalt.err (!%p967_p4)
}
 0x25a   : > { %815 = dma.vmem_to_hbm [thread:$0]  (%p1122_p3), %s1371_s7, 128, %s1369_s12, %s690_s17  }
 0x25b PF: > { %p821_p5 = scmp.ge.s32.totalorder %s1037_s16, 2  ;;  %s717_s5 = sand.u32 1, %s1009_s9  }
 0x25c   : > { %s718_s6 = scalar_lea.sflag [#allocation3], %s717_s5 }
 0x25d   : > { %p818_p6 = pnand %p821_p5, %p1131_p8 }
 0x25f   : > { %1004 = dma.done.wait (!%p818_p6), %s718_s6, 128  }
 0x260   : > { %1006 = vsyncadd (!%p818_p6), %s718_s6, 4294967168  ;;  %s15_s16 = sadd.s32 1, %s1037_s16   ;;  %s1429_s9 = smov %s1013_s10 }
 0x261   : > { %p12_p7 = scmp.ge.s32.totalorder %s15_s16, 6   ;;  %s1430_s10 = smov %s1017_s11 }
 0x262   : > { %s1431_s11 = smov %s1140_s27  ;;  %s1432_s12 = smov %s1029_s14 }
 0x263   : > { %s1433_s13 = smov %s1033_s15  ;;  %s1434_s14 = smov %s1437_s19 }
 0x264   : > { %s1435_s15 = smov %s1441_s20  ;;  %14 = sbr.rel (!%p12_p7) target bundleno = 5 (0x5), region = 63 }
 0x26b   :  { %723 = vsyncpa [#allocation3], 1 }
 0x26c   :  { %725 = vsyncpa [#allocation3 + $0x1], 1 }

</bundles_post_ra>
